<compile_context>
chip_gen: v7x
topology: tpu7x:2x2x1
jax: 0.10.0
libtpu: 0.0.40
codegen_flags: <defaults>
</compile_context>

<pallas_src>
import functools

import jax
import jax.numpy as jnp
from jax.experimental import pallas as pl
from jax.experimental.pallas import tpu as pltpu


def _round_up(x, m):
    return ((x + m - 1) // m) * m


def _cdiv(a, b):
    return -(-a // b)


def _vmem_capacity_bytes():
    """Per-core VMEM capacity; falls back to the v7x (smallest) value."""
    try:
        return int(pltpu.get_tpu_info().vmem_capacity_bytes)
    except Exception:
        return 64 << 20


def _is_v5e():
    try:
        kind = jax.devices()[0].device_kind.lower()
        return ("v5 lite" in kind) or ("v5e" in kind) or ("v5litepod" in kind)
    except Exception:
        return False


def _cls_seg_kernel(x_ref, w_ref, b_ref, o_ref, *, cast_bf16):
    # x_ref: (C, THW)   w_ref: (NC, C)   b_ref: (NC, 1)   o_ref: (NC, THW)
    x = x_ref[...]
    w = w_ref[...]
    if cast_bf16:
        # In-vreg cast only (zero extra HBM traffic); accumulation stays f32.
        x = x.astype(jnp.bfloat16)
        w = w.astype(jnp.bfloat16)
    acc = jnp.dot(w, x, preferred_element_type=jnp.float32)
    o_ref[...] = (acc + b_ref[...]).astype(o_ref.dtype)


def _pick_tile_hw(hw, c, num_classes, vmem_cap):
    """Largest lane tile fitting the per-generation VMEM budget, preferring
    tiles that cover or divide H*W exactly so no padding / ragged edge."""
    bytes_f32 = 4
    budget = int(vmem_cap * 0.7)          # ~44 MiB on v7x, ~89 MiB on v5e/v6e
    weight_bytes = 2 * (num_classes * c + num_classes) * bytes_f32
    per_lane = 2 * (c + num_classes) * bytes_f32   # double-buffered in + out
    max_tile = max(budget - weight_bytes, 0) // per_lane
    max_tile = max(128, (max_tile // 128) * 128)
    max_tile = min(max_tile, 8192)

    if hw <= max_tile:
        # Full-extent block: bypasses the 128-lane divisibility rule entirely.
        return hw
    if hw % 128 == 0:
        # Largest multiple-of-128 divisor of hw not exceeding max_tile.
        m = hw // 128
        for d in range(max_tile // 128, 0, -1):
            if m % d == 0:
                if d * 128 * 2 >= max_tile:   # only if reasonably large
                    return d * 128
                break
    # Ragged edge block: out-of-bounds lanes are garbage on read but stay
    # column-local in the matmul and are masked/dropped on store by Pallas.
    return max_tile


def cls_seg_pallas(feat_nchw, weight, bias):
    """1x1 conv (conv_seg) over an NCHW feature map, computed in NCHW layout.

    Args:
      feat_nchw: (N, C, H, W) feature map.
      weight:    (num_classes, C) — Conv2d weight with 1x1 spatial dims squeezed.
      bias:      (num_classes,)
    Returns:
      (N, num_classes, H, W) logits (same dtype as the feature map).
    """
    n, c, h, w = feat_nchw.shape
    num_classes = weight.shape[0]
    hw = h * w
    out_dtype = feat_nchw.dtype
    bytes_f32 = 4

    # NCHW -> (N, C, H*W): pure view-style reshape, no HBM copy, no padding.
    x = feat_nchw.reshape(n, c, hw)

    w_mat = weight.astype(jnp.float32)                      # (NC, C)
    b_col = bias.astype(jnp.float32).reshape(num_classes, 1)

    vmem_cap = _vmem_capacity_bytes()
    tile_hw = _pick_tile_hw(hw, c, num_classes, vmem_cap)
    num_tiles = _cdiv(hw, tile_hw)

    # Ensure >=2 grid steps when the spatial extent allows it, so both
    # TensorCores of a v7x chip (megacore) get work for batch=1 decode shapes.
    if n * num_tiles < 2 and hw >= 256:
        tile_hw = _round_up(_cdiv(hw, 2), 128)
        num_tiles = _cdiv(hw, tile_hw)

    # VMEM need: double-buffered x/out pixel tiles + (double-buffered) W/b.
    vmem_need = (2 * c * tile_hw * bytes_f32
                 + 2 * num_classes * tile_hw * bytes_f32
                 + 2 * (num_classes * c + num_classes) * bytes_f32)
    vmem_limit = int(min(max(vmem_need + (4 << 20), 32 << 20),
                         int(vmem_cap * 0.9)))
    vmem_limit = max(vmem_limit, vmem_need)   # never cap below actual need

    # v5e: f32 MXU throughput is a small fraction of bf16; for large class
    # counts keep the kernel firmly HBM-bound with in-register bf16 operands.
    cast_bf16 = _is_v5e() and num_classes >= 128

    cost = pl.CostEstimate(
        flops=2 * n * hw * c * num_classes,
        transcendentals=0,
        bytes_accessed=(n * c * hw + n * num_classes * hw
                        + num_classes * c + num_classes) * bytes_f32,
    )

    out = pl.pallas_call(
        functools.partial(_cls_seg_kernel, cast_bf16=cast_bf16),
        out_shape=jax.ShapeDtypeStruct((n, num_classes, hw), out_dtype),
        grid_spec=pltpu.PrefetchScalarGridSpec(
            num_scalar_prefetch=0,
            grid=(n, num_tiles),
            in_specs=[
                # x tile: batch dim squeezed, full C (sublane), tile_hw lanes.
                pl.BlockSpec((None, c, tile_hw), lambda b, j: (b, 0, j)),
                # weight / bias: tiny constants, resident across the grid.
                pl.BlockSpec((num_classes, c), lambda b, j: (0, 0)),
                pl.BlockSpec((num_classes, 1), lambda b, j: (0, 0)),
            ],
            out_specs=pl.BlockSpec((None, num_classes, tile_hw),
                                   lambda b, j: (b, 0, j)),
        ),
        compiler_params=pltpu.CompilerParams(
            dimension_semantics=("parallel", "parallel"),
            vmem_limit_bytes=vmem_limit,
        ),
        cost_estimate=cost,
    )(x, w_mat, b_col)

    # No class/pixel padding was introduced, so this is a free reshape.
    return out.reshape(n, num_classes, h, w)


class BaseDecodeHeadPallas:
    """Minimal concrete BaseDecodeHead: select input -> (dropout) -> conv_seg."""

    def __init__(self, in_channels, channels, *, num_classes,
                 dropout_ratio=0.1, in_index=-1, input_transform=None,
                 align_corners=False, seed=0):
        assert input_transform is None, "only single-input transform supported here"
        assert isinstance(in_channels, int) and isinstance(in_index, int)
        self.in_channels = in_channels
        self.channels = channels
        self.num_classes = num_classes
        self.dropout_ratio = dropout_ratio
        self.in_index = in_index
        self.align_corners = align_corners

        # conv_seg = nn.Conv2d(channels, num_classes, kernel_size=1)
        # init_weights(): normal_init(mean=0, std=0.01), bias -> 0
        key = jax.random.PRNGKey(seed)
        self.conv_seg_weight = (
            0.01 * jax.random.normal(key, (num_classes, channels), dtype=jnp.float32)
        )
        self.conv_seg_bias = jnp.zeros((num_classes,), dtype=jnp.float32)

    def _transform_inputs(self, inputs):
        # input_transform is None: select a single feature map.
        return inputs[self.in_index]

    def cls_seg(self, feat):
        # TODO(synk): nn.Dropout2d is identity in eval mode (forward_test path);
        # training-time channel dropout is not implemented here.
        return cls_seg_pallas(feat, self.conv_seg_weight, self.conv_seg_bias)

    def forward(self, inputs):
        feat = self._transform_inputs(inputs)
        return self.cls_seg(feat)


if __name__ == "__main__":
    # Small, forward-consistent shapes.
    batch, channels, height, width = 2, 32, 16, 16
    num_classes = 8

    key = jax.random.PRNGKey(0)
    # The (abstract) subclass forward would produce a `channels`-wide feature
    # map; here the selected input already has `channels` channels.
    feat = jax.random.normal(key, (batch, channels, height, width),
                             dtype=jnp.float32)
    inputs = [feat]  # list of multi-level features, in_index=-1 selects it

    head = BaseDecodeHeadPallas(
        in_channels=channels, channels=channels, num_classes=num_classes,
        dropout_ratio=0.1, in_index=-1, input_transform=None,
    )

    logits = head.forward(inputs)
    logits = jax.block_until_ready(logits)
    assert logits.shape == (batch, num_classes, height, width)

    # Reference check against plain-JAX 1x1 conv.
    ref = (
        jnp.einsum("nchw,kc->nkhw", feat, head.conv_seg_weight)
        + head.conv_seg_bias[None, :, None, None]
    )
    assert jnp.allclose(logits, ref, atol=1e-5), "mismatch vs reference"

    print("KERNEL_OK")
</pallas_src>

<mosaic_0001>
module attributes {stable_mosaic.version = 11 : i64} {
  func.func @_cls_seg_kernel(%arg0: i32, %arg1: i32, %arg2: memref<1x32x256xf32, #tpu.memory_space<vmem>>, %arg3: memref<8x32xf32, #tpu.memory_space<vmem>>, %arg4: memref<8x1xf32, #tpu.memory_space<vmem>>, %arg5: memref<1x8x256xf32, #tpu.memory_space<vmem>>) attributes {dimension_semantics = [#tpu.dimension_semantics<parallel>, #tpu.dimension_semantics<parallel>], iteration_bounds = array<i64: 2, 1>, scalar_prefetch = 0 : i64, scratch_operands = 0 : i64, tpu.core_type = #tpu.core_type<tc>, window_params = [{transform_indices = @transform_0, window_bounds = array<i64: 1, 32, 256>}, {pipeline_mode = #tpu.pipeline_mode<synchronous>, transform_indices = @transform_1, window_bounds = array<i64: 8, 32>}, {pipeline_mode = #tpu.pipeline_mode<synchronous>, transform_indices = @transform_2, window_bounds = array<i64: 8, 1>}, {transform_indices = @transform_3, window_bounds = array<i64: 1, 8, 256>}]} {
    %c0 = arith.constant 0 : index
    %c0_0 = arith.constant 0 : index
    %c0_1 = arith.constant 0 : index
    %0 = vector.load %arg2[%c0, %c0_0, %c0_1] : memref<1x32x256xf32, #tpu.memory_space<vmem>>, vector<1x32x256xf32>
    %1 = vector.shape_cast %0 : vector<1x32x256xf32> to vector<32x256xf32>
    %c0_2 = arith.constant 0 : index
    %c0_3 = arith.constant 0 : index
    %2 = vector.load %arg3[%c0_2, %c0_3] : memref<8x32xf32, #tpu.memory_space<vmem>>, vector<8x32xf32>
    %cst = arith.constant dense<0.000000e+00> : vector<8x256xf32>
    %3 = tpu.matmul %2, %1, %cst {dimension_numbers = #tpu.dot_dimension_numbers<[1], [0], [0], [1], [0, 0, 1, 1], [], []>} : vector<8x32xf32>, vector<32x256xf32>, vector<8x256xf32> -> vector<8x256xf32>
    %c0_4 = arith.constant 0 : index
    %c0_5 = arith.constant 0 : index
    %4 = vector.load %arg4[%c0_4, %c0_5] : memref<8x1xf32, #tpu.memory_space<vmem>>, vector<8x1xf32>
    %5 = vector.broadcast %4 : vector<8x1xf32> to vector<8x256xf32>
    %6 = arith.addf %3, %5 : vector<8x256xf32>
    %c0_6 = arith.constant 0 : index
    %c0_7 = arith.constant 0 : index
    %c0_8 = arith.constant 0 : index
    %7 = vector.load %arg5[%c0_6, %c0_7, %c0_8] : memref<1x8x256xf32, #tpu.memory_space<vmem>>, vector<1x8x256xf32>
    %8 = vector.shape_cast %7 : vector<1x8x256xf32> to vector<8x256xf32>
    %9 = vector.shape_cast %6 : vector<8x256xf32> to vector<1x8x256xf32>
    tpu.vector_store %arg5[%c0_6, %c0_7, %c0_8], %9 {strides = array<i32>} : memref<1x8x256xf32, #tpu.memory_space<vmem>>, vector<1x8x256xf32>,
    return
  }
  func.func @transform_0(%arg0: i32, %arg1: i32) -> (i32, i32, i32) {
    %c0_i32 = arith.constant 0 : i32
    %c0_i32_0 = arith.constant 0 : i32
    return %arg0, %c0_i32, %arg1 : i32, i32, i32
  }
  func.func @transform_1(%arg0: i32, %arg1: i32) -> (i32, i32) {
    %c0_i32 = arith.constant 0 : i32
    %c0_i32_0 = arith.constant 0 : i32
    %c0_i32_1 = arith.constant 0 : i32
    return %c0_i32, %c0_i32_0 : i32, i32
  }
  func.func @transform_2(%arg0: i32, %arg1: i32) -> (i32, i32) {
    %c0_i32 = arith.constant 0 : i32
    %c0_i32_0 = arith.constant 0 : i32
    %c0_i32_1 = arith.constant 0 : i32
    return %c0_i32, %c0_i32_0 : i32, i32
  }
  func.func @transform_3(%arg0: i32, %arg1: i32) -> (i32, i32, i32) {
    %c0_i32 = arith.constant 0 : i32
    %c0_i32_0 = arith.constant 0 : i32
    return %arg0, %c0_i32, %arg1 : i32, i32, i32
  }
}

</mosaic_0001>

<bundles_post_ra>
// kernel: tpu_custom_call.1
= control target key start
LH: loop header
LB: loop body
LE: loop exit
PB: predicated region body
PF: predicated region fallthrough
CT: control target
= control target key end

     0   :  { %8 = vsyncpa [#allocation3], 0  ;;  %s815_s0 = inlined_call_operand.hbm [shape: f32[2,32,256], index: 0, kind: input, shape index: {}]   ;;  %s816_s1 = inlined_call_operand.vmem [shape: f32[8,32], index: 1, kind: input, shape index: {}]   ;;  %s817_s2 = inlined_call_operand.vmem [shape: f32[8,1], index: 2, kind: input, shape index: {}]   ;;  %s818_s3 = inlined_call_operand.hbm [shape: f32[2,8,256], index: 3, kind: output, shape index: {}]  }
   0x1   :  { %10 = vsyncpa [#allocation3 + $0x1], 0 }
   0x2   :  { %11 = vsyncpa [#allocation4], 0 }
   0x3   :  { %13 = vsyncpa [#allocation4 + $0x1], 0  ;;  %s635_s12 = smov 0   ;;  %s637_s13 = smov 0  }
   0x4   :  { %s639_s14 = smov 0   ;;  %s641_s15 = smov 0  }
   0x5   :  { %s643_s16 = smov 0   ;;  %s645_s17 = smov 0  }
   0x6 LB: > { %s402_s18 = sadd.s32 4294967295, %s607_s17   ;;  %s403_s19 = sadd.s32 4294967294, %s607_s17   ;;  %s607_s17 = sphi %s645_s17, %s19_s17   ;;  %s603_s16 = sphi %s643_s16, %s833_s16   ;;  %s599_s15 = sphi %s641_s15, %s832_s15   ;;  %s595_s14 = sphi %s639_s14, %s831_s14   ;;  %s591_s13 = sphi %s637_s13, %s830_s13   ;;  %s587_s12 = sphi %s635_s12, %s829_s12  }
   0x7   : > { %s31_s20 = sadd.s32 1, %s603_s16  ;;  %s40_s21 = sadd.s32 1, %s595_s14 }
   0x8   : > { %p33_p0 = scmp.ge.s32.totalorder %s31_s20, 2  ;;  %p47_p1 = scmp.ne.s32.totalorder %s595_s14, %s591_s13 }
   0x9   : > { %p48_p2 = scmp.eq.s32.totalorder %s607_s17, 0  ;;  %p53_p3 = scmp.ne.s32.totalorder %s591_s13, %s587_s12 }
   0xa   : > { %s835_s20 = smov (%p33_p0, %s31_s20), 0  ;;  %p54_p5 = scmp.eq.s32.totalorder %s402_s18, 0 }
   0xb   : > { %p676_p4 = por %p48_p2, %p47_p1  ;;  %s35_s23 = ssub.s32 %s603_s16, %s835_s20 }
   0xc   : > { %p121_p6 = scmp.eq.s32.totalorder %s402_s18, 1  ;;  %p38_p7 = scmp.eq.s32.totalorder %s35_s23, 0 }
   0xd   : > { %p682_p8 = por %p54_p5, %p53_p3  ;;  %p127_p10 = scmp.eq.s32.totalorder %s403_s19, 1 }
   0xe   : > { %p686_p9 = por %p121_p6, %p47_p1  ;;  %p440_p13 = scmp.lt.s32.totalorder %s607_s17, 2 }
   0xf   : > { %s691_s26 = scalar_select %p38_p7, %s595_s14, %s40_s21  }
  0x10   : > { %s822_s25 = scalar_select %p686_p9, 1, 0 }
  0x11   : > { %p693_p11 = por %p127_p10, %p53_p3  ;;  %s153_s28 = sand.u32 1, %s595_s14  }
  0x12   : > { %s406_s29 = sshll.u32 %s153_s28, 6  ;;  %s418_s30 = sshll.u32 %s603_s16, 10 }
  0x13   : > { %s823_s27 = scalar_select %p693_p11, 1, 0 }
  0x14   : > { %s704_s6 = scalar_lea.hbm %s815_s0, %s418_s30  ;;  %s157_s7 = scalar_lea.vmem [#allocation2], %s406_s29 }
  0x15   : > { %s166_s8 = sshll.u32 %s157_s7, 4  ;;  %p710_p0 = pnand %p440_p13, %p676_p4  ;;  %s706_s8 = int_to_ptr.vmem [resolvable:$true] %s166_s8 }
  0x16   : > { %s715_s10 = scalar_lea.sflag [#allocation3], %s153_s28  ;;  %s495_s11 = scalar_lea.hbm %s704_s6, 1024 }
  0x17   : > { %p496_p2 = scmp.ne.s32.totalorder %s704_s6, %s495_s11  ;;  %p497_p3 = pneg %p710_p0 }
  0x18   : > { %s500_s21 = scalar_lea.hbm %s815_s0, 2048  ;;  %p501_p4 = scmp.lt.u32.totalorder %s704_s6, %s815_s0 }
  0x19   : > { %p498_p5 = pnand %p497_p3, %p496_p2  ;;  %p502_p7 = scmp.lt.u32.totalorder %s500_s21, %s495_s11 }
  0x1a   : > { %p504_p13 = scmp.lt.u32.totalorder %s495_s11, %s704_s6 }
  0x1b   : > { %p499_p6 = pneg %p498_p5  ;;  %p503_p10 = por %p502_p7, %p501_p4 }
  0x1d   : > { %p505_p12 = por %p504_p13, %p503_p10 }
  0x1f   : > { %p506_p1 = pnand %p505_p12, %p499_p6 }
  0x21   : > { %509 = shalt.err (!%p506_p1)
}
  0x22   : > { %s510_s28 = scalar_lea.vmem %s706_s8, 1024  ;;  %s609_s29 = smov [#allocation2]  }
  0x23   : > { %p511_p2 = scmp.ne.s32.totalorder %s706_s8, %s510_s28  ;;  %s515_s30 = sshll.u32 %s609_s29, 4  ;;  %s516_s30 = int_to_ptr.vmem [resolvable:$false] %s515_s30 }
  0x24   : > { %s517_s4 = scalar_lea.vmem %s516_s30, 2048  ;;  %p518_p9 = scmp.lt.s32.totalorder %s706_s8, %s516_s30 }
  0x25   : > { %p513_p5 = pnand %p511_p2, %p497_p3  ;;  %p519_p4 = scmp.lt.s32.totalorder %s517_s4, %s510_s28 }
  0x27   : > { %p514_p11 = pneg %p513_p5  ;;  %p520_p7 = por %p519_p4, %p518_p9 }
  0x29   : > { %p521_p10 = pnand %p520_p7, %p514_p11 }
  0x2b   : > { %524 = shalt.err (!%p521_p10)
}
  0x2c   : > { %s610_s5 = smov 256   ;;  %s611_s7 = smov 16  }
  0x2d   : > { %435 = dma.hbm_to_vmem [thread:$0]  (!%p710_p0), %s704_s6, 1024, %s706_s8, %s715_s10, %s610_s5, %s610_s5, %s611_s7  }
  0x2e   : > { %p174_p12 = scmp.lt.s32.totalorder %s607_s17, 3  ;;  %p825_p1 = scmp.ge.s32.totalorder %s607_s17, 1 }
  0x30   : > { %p175_p3 = pnand %p825_p1, %p174_p12 }
  0x31   : > { %s747_s11 = sand.u32 (!%p175_p3), 1, %s591_s13  }
  0x32   : > { %178 = sbr.rel (%p175_p3) target bundleno = 298 (0x12a), region = 32  ;;  %s410_s18 = sshll.u32 (!%p175_p3), %s747_s11, 6 }
  0x33   : > { %s181_s19 = scalar_lea.sflag (!%p175_p3), [#allocation3], %s747_s11  ;;  %s184_s21 = scalar_lea.vmem (!%p175_p3), [#allocation2], %s410_s18 }
  0x39   : > { %578 = dma.done.wait (%p682_p8), %s181_s19, 1024  }
  0x3a   : > { %580 = vsyncadd (%p682_p8), %s181_s19, 4294966272  ;;  %v612_v0 = vmov 0.0   ;;  %v613_v1 = vmov 0   ;;  %v210_v2 = vld [vmem:[%s184_s21 + $0x8] sm:$0xff]  ;;  %v212_v3 = vld [vmem:[%s184_s21 + $0x18] sm:$0xff]  ;;  %vm224_vm0 = vcmask 261120  }
  0x3b   : > { %292 = vmatprep.mubr.f32.mxu0 %v612_v0  ;;  %494 = vset.pattern.permute.xlu0 %v613_v1  ;;  %v209_v4 = vld [vmem:[%s184_s21] sm:$0xff]  ;;  %v420_v5 = vpack.c.bf16 %v212_v3, %v210_v2  ;;  %v211_v6 = vld [vmem:[%s184_s21 + $0x10] sm:$0xff]  ;;  %v214_v7 = vld [vmem:[%s184_s21 + $0x28] sm:$0xff]  ;;  %s411_s10 = sshll.u32 %s747_s11, 4  ;;  %s419_s22 = sshll.u32 %s599_s15, 8 }
  0x3c   : > { %v216_v8 = vld [vmem:[%s184_s21 + $0x38] sm:$0xff]  ;;  %v422_v9 = vpack.c.bf16 %v211_v6, %v209_v4  ;;  %v213_v11 = vld [vmem:[%s184_s21 + $0x20] sm:$0xff]  ;;  %v215_v12 = vld [vmem:[%s184_s21 + $0x30] sm:$0xff]  ;;  %s206_s23 = scalar_lea.vmem [#allocation5], %s411_s10  ;;  %s766_s4 = scalar_lea.hbm %s818_s3, %s419_s22 }
  0x3d   : > { %v424_v10 = vpack.c.bf16 %v216_v8, %v214_v7  ;;  %421 = vmatprep.subr.bf16.mxu0 %v420_v5  ;;  %v218_v13 = vld [vmem:[%s817_s2] sm:$0xff]  ;;  %v426_v14 = vpack.c.bf16 %v215_v12, %v213_v11  ;;  %s318_s28 = sshll.u32 %s206_s23, 4  ;;  %s302_s5 = scalar_lea.sflag [#allocation4], %s747_s11  ;;  %s768_s28 = int_to_ptr.vmem [resolvable:$true] %s318_s28 }
  0x3e   : > { %423 = vmatpush1.bf16.msra.mxu0 %v422_v9  ;;  %221 = vperm.xlu0 %494, %v218_v13   ;;  %v217_v15 = vld [vmem:[%s816_s1] sm:$0xff]  ;;  %s525_s15 = scalar_lea.vmem %s768_s28, 256  ;;  %p826_p9 = scmp.ne.s32.totalorder %s822_s25, 0 }
  0x3f   : > { %425 = vmatprep.subr.bf16.mxu0 %v424_v10  ;;  %p526_p8 = scmp.ne.s32.totalorder %s768_s28, %s525_s15  ;;  %s614_s7 = smov [#allocation5]  }
  0x40   : > { %s529_s18 = sshll.u32 %s614_s7, 4  ;;  %s530_s18 = int_to_ptr.vmem [resolvable:$false] %s529_s18 }
  0x41   : > { %p527_p11 = pnand %p526_p8, %p826_p9  ;;  %s531_s19 = scalar_lea.vmem %s530_s18, 512 }
  0x42   : > { %427 = vmatpush1.bf16.msra.mxu0 %v426_v14  ;;  %p532_p6 = scmp.lt.s32.totalorder %s768_s28, %s530_s18  ;;  %p533_p13 = scmp.lt.s32.totalorder %s531_s19, %s525_s15 }
  0x43   : > { %p528_p0 = pneg %p527_p11 }
  0x44   : > { %p534_p2 = por %p533_p13, %p532_p6 }
  0x45   : > { %412 = vmatmul.mubr.msk.f32.vlgmr.msra.gmra.mrb[0].mxu0 %vm224_vm0, %v217_v15 }
  0x46   : > { %p535_p5 = pnand %p534_p2, %p528_p0 }
  0xbd   : > { %v222_v16 = vpop.permute.xlu0 %221 }
 0x118   : > { %v294_v17 = vpop.f32.mrb[0].mxu0 }
 0x119   : > { %v295_v18 = vadd.f32 %v294_v17, %v222_v16  ;;  %v296_v19 = vpop.f32.mrb[1].mxu0 }
 0x11a   : > { %v297_v20 = vadd.f32 %v296_v19, %v222_v16 }
 0x11b   : > { %299 = vst [vmem:[%s206_s23] sm:$0xff] %v295_v18 }
 0x11c   : > { %300 = vst [vmem:[%s206_s23 + $0x8] sm:$0xff] %v297_v20 }
 0x11d   : > { %538 = shalt.err (!%p535_p5)
}
 0x11e   : > { %s539_s11 = scalar_lea.hbm %s766_s4, 256  ;;  %s543_s6 = scalar_lea.hbm %s818_s3, 512 }
 0x11f   : > { %p540_p4 = scmp.ne.s32.totalorder %s766_s4, %s539_s11  ;;  %p544_p12 = scmp.lt.u32.totalorder %s766_s4, %s818_s3 }
 0x120   : > { %p545_p1 = scmp.lt.u32.totalorder %s543_s6, %s539_s11  ;;  %p547_p8 = scmp.lt.u32.totalorder %s539_s11, %s766_s4 }
 0x121   : > { %p541_p7 = pnand %p540_p4, %p826_p9 }
 0x122   : > { %p546_p3 = por %p545_p1, %p544_p12 }
 0x123   : > { %p542_p10 = pneg %p541_p7 }
 0x124   : > { %p548_p11 = por %p547_p8, %p546_p3 }
 0x126   : > { %p549_p0 = pnand %p548_p11, %p542_p10 }
 0x128   : > { %552 = shalt.err (!%p549_p0)
}
 0x129   : > { %430 = dma.vmem_to_hbm [thread:$0]  (%p826_p9), %s768_s28, 256, %s766_s4, %s302_s5  }
 0x12a PF: > { %s330_s10 = sand.u32 1, %s587_s12   ;;  %p827_p6 = scmp.ne.s32.totalorder %s823_s27, 0 }
 0x12b   : > { %p828_p13 = scmp.ge.s32.totalorder %s607_s17, 2  ;;  %s331_s22 = scalar_lea.sflag [#allocation4], %s330_s10 }
 0x12d   : > { %p437_p2 = pnand %p828_p13, %p827_p6 }
 0x12f   : > { %582 = dma.done.wait (!%p437_p2), %s331_s22, 256  }
 0x130   : > { %584 = vsyncadd (!%p437_p2), %s331_s22, 4294967040  ;;  %s19_s17 = sadd.s32 1, %s607_s17   ;;  %s829_s12 = smov %s591_s13 }
 0x131   : > { %p16_p5 = scmp.ge.s32.totalorder %s19_s17, 4   ;;  %s830_s13 = smov %s595_s14 }
 0x132   : > { %s831_s14 = smov %s691_s26  ;;  %s832_s15 = smov %s603_s16 }
 0x133   : > { %s833_s16 = smov %s835_s20  ;;  %18 = sbr.rel (!%p16_p5) target bundleno = 6 (0x6), region = 77 }
 0x13a   :  { %336 = vsyncpa [#allocation3], 1 }
 0x13b   :  { %338 = vsyncpa [#allocation3 + $0x1], 1 }
 0x13c   :  { %339 = vsyncpa [#allocation4], 1 }
 0x13d   :  { %341 = vsyncpa [#allocation4 + $0x1], 1 }

</bundles_post_ra>
